<compile_context>
chip_gen: v7x
topology: tpu7x:2x2x1
jax: 0.10.0
libtpu: 0.0.40
codegen_flags: <defaults>
</compile_context>

<pallas_src>
import jax
import jax.numpy as jnp
from jax import lax
from jax.experimental import pallas as pl
from jax.experimental.pallas import tpu as pltpu

EPS = 1e-5          # nn.BatchNorm2d default eps
NEG_SLOPE = 0.01    # nn.LeakyReLU default negative_slope


def _round_up(a, b):
    return (a + b - 1) // b * b


def _conv_stats_kernel(a_ref, b_ref, conv_ref, stats_ref):
    """One (phase, M-tile) step: packed complex matmul + per-channel sum / sumsq."""
    i = pl.program_id(1)                       # M-tile index within the current phase

    @pl.when(i == 0)
    def _():
        stats_ref[...] = jnp.zeros_like(stats_ref)

    # (TM, KP) bf16 @ (KP, CP) bf16 -> (TM, CP) f32 on the MXU.
    conv = jnp.dot(a_ref[...], b_ref[...], preferred_element_type=jnp.float32)
    conv_ref[...] = conv.astype(conv_ref.dtype)                 # bf16 staging slab

    # Batch stats reduced from the f32 matmul result (padded rows/cols are exact 0s).
    s = jnp.sum(conv, axis=0, keepdims=True)                    # (1, CP)
    sq = jnp.sum(conv * conv, axis=0, keepdims=True)            # (1, CP)
    stats_ref[:, 0:1, :] = stats_ref[:, 0:1, :] + s[None]
    stats_ref[:, 1:2, :] = stats_ref[:, 1:2, :] + sq[None]


def decoder_forward(x, params, kernel_size, stride, padding=(0, 0), tile_m=1024):
    """x: (N, C_in, H, W, 2) float32 -> (N, C_out, OH, OW, 2) float32."""
    N, Cin, H, W, _ = x.shape
    KH, KW = kernel_size
    sH, sW = stride
    pH, pW = padding
    Cout = params["w_re"].shape[1]
    OH = (H - 1) * sH - 2 * pH + KH
    OW = (W - 1) * sW - 2 * pW + KW
    M_total = N * OH * OW

    # ---- glue: NCHW(+complex) -> NHWC, cast to bf16 once (matmul operands are bf16) ----
    x_nhwc = jnp.transpose(x, (0, 2, 3, 1, 4)).astype(jnp.bfloat16)
    xre, xim = x_nhwc[..., 0], x_nhwc[..., 1]                   # (N, H, W, Cin)
    w_re = params["w_re"].astype(jnp.float32)                   # (Cin, Cout, KH, KW)
    w_im = params["w_im"].astype(jnp.float32)
    # ConvTranspose bias intentionally dropped: a per-channel constant added right
    # before a training-mode BatchNorm cancels exactly in the batch-mean subtraction.

    # ---- polyphase decomposition ------------------------------------------------
    # out[oh, ow] with oh = ph + j*sH only receives taps kh === (ph+pH) mod sH, and
    # the contributing input row is ih = j + d_kh with d_kh = (ph + pH - kh) / sH.
    def axis_phase(phase, pad, k, s, in_len, out_len):
        ks = [kk for kk in range(k) if (phase + pad - kk) % s == 0]
        ds = [(phase + pad - kk) // s for kk in ks]
        n_out = (out_len - 1 - phase) // s + 1
        lo = max([0] + [-d for d in ds])
        hi = max([0] + [d + n_out - in_len for d in ds])
        return ks, ds, n_out, lo, hi

    phases = []
    for ph in range(sH):
        khs, dhs, OHp, pt, pb = axis_phase(ph, pH, KH, sH, H, OH)
        for pw_ in range(sW):
            kws, dws, OWp, plft, prgt = axis_phase(pw_, pW, KW, sW, W, OW)
            phases.append(dict(ph=ph, pw=pw_, khs=khs, dhs=dhs, kws=kws, dws=dws,
                               OHp=OHp, OWp=OWp, pt=pt, pb=pb, plft=plft, prgt=prgt))
    n_phases = len(phases)

    # one global pad of the (small, undilated) input covers every phase
    PT = max(p["pt"] for p in phases); PB = max(p["pb"] for p in phases)
    PL = max(p["plft"] for p in phases); PR = max(p["prgt"] for p in phases)
    xre_p = jnp.pad(xre, ((0, 0), (PT, PB), (PL, PR), (0, 0)))
    xim_p = jnp.pad(xim, ((0, 0), (PT, PB), (PL, PR), (0, 0)))

    max_taps = max(1, max(len(p["khs"]) * len(p["kws"]) for p in phases))
    max_Mp = max(N * p["OHp"] * p["OWp"] for p in phases)

    # lane/sublane-friendly padded shapes (bf16 operands, f32 MXU accumulation)
    KP = max(128, _round_up(2 * max_taps * Cin, 128))
    CP = max(128, _round_up(2 * Cout, 128))
    TM = min(tile_m, _round_up(max_Mp, 8))      # big M tiles; clamp for tiny shapes
    MPP = _round_up(max_Mp, TM)
    n_m = MPP // TM

    # TODO(synk): for very large K (taps*Cin) the bf16 operands may need split-K or
    # f32 staging to hold a tighter tolerance than ~1e-2.
    # TODO(synk): longer term, gather the patches in-kernel (scalar-prefetch index_map
    # / manual DMA) so the A slab is never materialized in HBM.
    a_blocks, b_blocks = [], []
    for p in phases:
        Mp = N * p["OHp"] * p["OWp"]
        taps = [(kh, dh, kw, dw)
                for kh, dh in zip(p["khs"], p["dhs"])
                for kw, dw in zip(p["kws"], p["dws"])]
        if taps:
            def gather(xc):
                cols = [xc[:, dh + PT: dh + PT + p["OHp"],
                            dw + PL: dw + PL + p["OWp"], :]
                        for (_, dh, _, dw) in taps]
                return jnp.concatenate(cols, axis=-1).reshape(Mp, len(taps) * Cin)
            p_re, p_im = gather(xre_p), gather(xim_p)
            w2_re = jnp.stack([w_re[:, :, kh, kw] for (kh, _, kw, _) in taps],
                              axis=0).reshape(len(taps) * Cin, Cout)
            w2_im = jnp.stack([w_im[:, :, kh, kw] for (kh, _, kw, _) in taps],
                              axis=0).reshape(len(taps) * Cin, Cout)
        else:  # stride > kernel: this phase receives no taps -> exact zeros
            p_re = p_im = jnp.zeros((Mp, Cin), jnp.bfloat16)
            w2_re = w2_im = jnp.zeros((Cin, Cout), jnp.float32)

        Kp2 = 2 * p_re.shape[1]
        A_p = jnp.concatenate([p_re, p_im], axis=1)                     # (Mp, 2Kp)
        A_p = jnp.pad(A_p, ((0, MPP - Mp), (0, KP - Kp2)))
        B_p = jnp.concatenate([jnp.concatenate([w2_re, w2_im], axis=1),
                               jnp.concatenate([-w2_im, w2_re], axis=1)], axis=0)
        B_p = jnp.pad(B_p, ((0, KP - Kp2), (0, CP - 2 * Cout))).astype(jnp.bfloat16)
        a_blocks.append(A_p)
        b_blocks.append(B_p)

    A = jnp.concatenate(a_blocks, axis=0)              # (n_phases*MPP, KP) bf16
    B = jnp.concatenate(b_blocks, axis=0)              # (n_phases*KP,  CP) bf16

    conv, stats = pl.pallas_call(
        _conv_stats_kernel,
        out_shape=(jax.ShapeDtypeStruct((n_phases * MPP, CP), jnp.bfloat16),
                   jax.ShapeDtypeStruct((n_phases, 2, CP), jnp.float32)),
        grid=(n_phases, n_m),
        in_specs=[pl.BlockSpec((TM, KP), lambda q, i: (q * n_m + i, 0)),   # A tiles
                  pl.BlockSpec((KP, CP), lambda q, i: (q, 0))],            # per-phase B
        out_specs=(pl.BlockSpec((TM, CP), lambda q, i: (q * n_m + i, 0)),  # bf16 slab
                   pl.BlockSpec((1, 2, CP), lambda q, i: (q, 0, 0))),      # stats/phase
        compiler_params=pltpu.CompilerParams(
            # phase axis "parallel" (megacore-sharded on v7x); M axis "arbitrary"
            # because the per-phase stats block is revisited / accumulated across it.
            dimension_semantics=("parallel", "arbitrary")),
        cost_estimate=pl.CostEstimate(
            flops=2 * n_phases * MPP * KP * CP, transcendentals=0,
            bytes_accessed=(A.size + B.size + n_phases * MPP * CP) * 2
                           + n_phases * 2 * CP * 4),
    )(A, B)

    # ---- fold training-mode BatchNorm into per-channel scale/shift; LeakyReLU and
    # the compact unpack happen in plain JAX and fuse under jit (no second pass
    # over the padded slab). ----
    # TODO(synk): running mean/var (momentum) buffer updates are training-state
    # bookkeeping, not part of the returned tensor; only the normalized output is made.
    total = jnp.sum(stats, axis=0)                                   # (2, CP) f32
    mean = total[0, :2 * Cout] / M_total
    var = jnp.maximum(total[1, :2 * Cout] / M_total - mean * mean, 0.0)
    gamma = jnp.concatenate([params["g_re"], params["g_im"]]).astype(jnp.float32)
    beta = jnp.concatenate([params["beta_re"], params["beta_im"]]).astype(jnp.float32)
    scale = gamma * lax.rsqrt(var + EPS)
    shift = beta - mean * scale

    out_nhwc = jnp.zeros((N, OH, OW, Cout, 2), jnp.float32)
    for idx, p in enumerate(phases):
        Mp = N * p["OHp"] * p["OWp"]
        slab = conv[idx * MPP: idx * MPP + Mp, :2 * Cout].astype(jnp.float32)
        y = slab * scale[None, :] + shift[None, :]
        y = jnp.where(y >= 0, y, NEG_SLOPE * y)
        yp = jnp.stack([y[:, :Cout], y[:, Cout:]], axis=-1)          # (Mp, Cout, 2)
        yp = yp.reshape(N, p["OHp"], p["OWp"], Cout, 2)
        out_nhwc = out_nhwc.at[:, p["ph"]::sH, p["pw"]::sW].set(yp)
    return jnp.transpose(out_nhwc, (0, 3, 1, 2, 4))


def reference_decoder(x, params, kernel_size, stride, padding=(0, 0)):
    """Pure-JAX reference of the PyTorch forward (training-mode BN, bias included)."""
    KH, KW = kernel_size
    sH, sW = stride
    pH, pW = padding

    def tconv(xin, w, b):  # ConvTranspose2d via lhs-dilated correlation
        rhs = jnp.transpose(jnp.flip(w, (2, 3)), (1, 0, 2, 3))      # (Cout, Cin, KH, KW)
        out = lax.conv_general_dilated(
            xin, rhs, window_strides=(1, 1),
            padding=[(KH - 1 - pH,) * 2, (KW - 1 - pW,) * 2],
            lhs_dilation=(sH, sW),
            dimension_numbers=("NCHW", "OIHW", "NCHW"),
            precision=lax.Precision.HIGHEST)
        return out + b[None, :, None, None]

    xre, xim = x[..., 0], x[..., 1]
    cre = tconv(xre, params["w_re"], params["b_re"]) - tconv(xim, params["w_im"], params["b_im"])
    cim = tconv(xim, params["w_re"], params["b_re"]) + tconv(xre, params["w_im"], params["b_im"])

    def bn_leaky(xc, g, be):
        mean = xc.mean(axis=(0, 2, 3), keepdims=True)
        var = ((xc - mean) ** 2).mean(axis=(0, 2, 3), keepdims=True)
        y = (xc - mean) / jnp.sqrt(var + EPS) * g[None, :, None, None] + be[None, :, None, None]
        return jnp.where(y >= 0, y, NEG_SLOPE * y)

    return jnp.stack((bn_leaky(cre, params["g_re"], params["beta_re"]),
                      bn_leaky(cim, params["g_im"], params["beta_im"])), axis=-1)


if __name__ == "__main__":
    # Decoder(in_channels=4, out_channels=4, kernel_size=(3,3), stride=(2,2),
    #         padding=(0,0), complex=True)
    N, Cin, Cout, H, W = 2, 4, 4, 8, 8
    kernel_size, stride, padding = (3, 3), (2, 2), (0, 0)
    KH, KW = kernel_size

    key = jax.random.PRNGKey(0)
    ks = jax.random.split(key, 9)
    params = {
        "w_re": 0.2 * jax.random.normal(ks[0], (Cin, Cout, KH, KW), jnp.float32),
        "w_im": 0.2 * jax.random.normal(ks[1], (Cin, Cout, KH, KW), jnp.float32),
        "b_re": 0.1 * jax.random.normal(ks[2], (Cout,), jnp.float32),
        "b_im": 0.1 * jax.random.normal(ks[3], (Cout,), jnp.float32),
        "g_re": 1.0 + 0.1 * jax.random.normal(ks[4], (Cout,), jnp.float32),
        "beta_re": 0.1 * jax.random.normal(ks[5], (Cout,), jnp.float32),
        "g_im": 1.0 + 0.1 * jax.random.normal(ks[6], (Cout,), jnp.float32),
        "beta_im": 0.1 * jax.random.normal(ks[7], (Cout,), jnp.float32),
    }
    x = jax.random.normal(ks[8], (N, Cin, H, W, 2), jnp.float32)

    @jax.jit
    def run(xx, pp):
        return decoder_forward(xx, pp, kernel_size, stride, padding)

    out = jax.block_until_ready(run(x, params))

    ref = reference_decoder(x, params, kernel_size, stride, padding)
    assert out.shape == ref.shape, (out.shape, ref.shape)
    max_err = float(jnp.max(jnp.abs(out - ref)))
    assert max_err < 5e-2, f"mismatch vs reference: {max_err}"

    print("KERNEL_OK")
</pallas_src>

<mosaic_0001>
module attributes {stable_mosaic.version = 11 : i64} {
  func.func @_conv_stats_kernel(%arg0: i32, %arg1: i32, %arg2: memref<168x128xbf16, #tpu.memory_space<vmem>>, %arg3: memref<128x128xbf16, #tpu.memory_space<vmem>>, %arg4: memref<168x128xbf16, #tpu.memory_space<vmem>>, %arg5: memref<1x2x128xf32, #tpu.memory_space<vmem>>) attributes {dimension_semantics = [#tpu.dimension_semantics<parallel>, #tpu.dimension_semantics<arbitrary>], iteration_bounds = array<i64: 4, 1>, scalar_prefetch = 0 : i64, scratch_operands = 0 : i64, tpu.core_type = #tpu.core_type<tc>, window_params = [{transform_indices = @transform_0, window_bounds = array<i64: 168, 128>}, {transform_indices = @transform_1, window_bounds = array<i64: 128, 128>}, {transform_indices = @transform_2, window_bounds = array<i64: 168, 128>}, {transform_indices = @transform_3, window_bounds = array<i64: 1, 2, 128>}]} {
    %c0_i32 = arith.constant 0 : i32
    %0 = arith.cmpi eq, %arg1, %c0_i32 : i32
    %1 = arith.extui %0 : i1 to i32
    %c0_i32_0 = arith.constant 0 : i32
    %2 = arith.cmpi ne, %1, %c0_i32_0 : i32
    scf.if %2 {
      %cst_19 = arith.constant 0.000000e+00 : f32
      %21 = vector.broadcast %cst_19 : f32 to vector<1x2x128xf32>
      %c0_20 = arith.constant 0 : index
      %c0_21 = arith.constant 0 : index
      %c0_22 = arith.constant 0 : index
      %22 = vector.load %arg5[%c0_20, %c0_21, %c0_22] : memref<1x2x128xf32, #tpu.memory_space<vmem>>, vector<1x2x128xf32>
      tpu.vector_store %arg5[%c0_20, %c0_21, %c0_22], %21 {strides = array<i32>} : memref<1x2x128xf32, #tpu.memory_space<vmem>>, vector<1x2x128xf32>,
    } else {
    }
    %c0 = arith.constant 0 : index
    %c0_1 = arith.constant 0 : index
    %3 = vector.load %arg2[%c0, %c0_1] : memref<168x128xbf16, #tpu.memory_space<vmem>>, vector<168x128xbf16>
    %c0_2 = arith.constant 0 : index
    %c0_3 = arith.constant 0 : index
    %4 = vector.load %arg3[%c0_2, %c0_3] : memref<128x128xbf16, #tpu.memory_space<vmem>>, vector<128x128xbf16>
    %cst = arith.constant dense<0.000000e+00> : vector<168x128xf32>
    %5 = tpu.matmul %3, %4, %cst {dimension_numbers = #tpu.dot_dimension_numbers<[1], [0], [0], [1], [0, 0, 1, 1], [], []>} : vector<168x128xbf16>, vector<128x128xbf16>, vector<168x128xf32> -> vector<168x128xf32>
    %6 = arith.truncf %5 : vector<168x128xf32> to vector<168x128xbf16>
    %c0_4 = arith.constant 0 : index
    %c0_5 = arith.constant 0 : index
    %7 = vector.load %arg4[%c0_4, %c0_5] : memref<168x128xbf16, #tpu.memory_space<vmem>>, vector<168x128xbf16>
    tpu.vector_store %arg4[%c0_4, %c0_5], %6 {strides = array<i32>} : memref<168x128xbf16, #tpu.memory_space<vmem>>, vector<168x128xbf16>,
    %cst_6 = arith.constant dense<0.000000e+00> : vector<128xf32>
    %8 = vector.multi_reduction <add>, %5, %cst_6 [0] : vector<168x128xf32> to vector<128xf32>
    %9 = vector.shape_cast %8 : vector<128xf32> to vector<1x128xf32>
    %10 = arith.mulf %5, %5 : vector<168x128xf32>
    %cst_7 = arith.constant dense<0.000000e+00> : vector<128xf32>
    %11 = vector.multi_reduction <add>, %10, %cst_7 [0] : vector<168x128xf32> to vector<128xf32>
    %12 = vector.shape_cast %11 : vector<128xf32> to vector<1x128xf32>
    %c0_8 = arith.constant 0 : index
    %c0_9 = arith.constant 0 : index
    %c0_10 = arith.constant 0 : index
    %13 = vector.load %arg5[%c0_8, %c0_9, %c0_10] : memref<1x2x128xf32, #tpu.memory_space<vmem>>, vector<1x1x128xf32>
    %14 = vector.shape_cast %9 : vector<1x128xf32> to vector<1x1x128xf32>
    %15 = arith.addf %13, %14 : vector<1x1x128xf32>
    %c0_11 = arith.constant 0 : index
    %c0_12 = arith.constant 0 : index
    %c0_13 = arith.constant 0 : index
    %16 = vector.load %arg5[%c0_11, %c0_12, %c0_13] : memref<1x2x128xf32, #tpu.memory_space<vmem>>, vector<1x1x128xf32>
    tpu.vector_store %arg5[%c0_11, %c0_12, %c0_13], %15 {strides = array<i32>} : memref<1x2x128xf32, #tpu.memory_space<vmem>>, vector<1x1x128xf32>,
    %c0_14 = arith.constant 0 : index
    %c1 = arith.constant 1 : index
    %c0_15 = arith.constant 0 : index
    %17 = vector.load %arg5[%c0_14, %c1, %c0_15] : memref<1x2x128xf32, #tpu.memory_space<vmem>>, vector<1x1x128xf32>
    %18 = vector.shape_cast %12 : vector<1x128xf32> to vector<1x1x128xf32>
    %19 = arith.addf %17, %18 : vector<1x1x128xf32>
    %c0_16 = arith.constant 0 : index
    %c1_17 = arith.constant 1 : index
    %c0_18 = arith.constant 0 : index
    %20 = vector.load %arg5[%c0_16, %c1_17, %c0_18] : memref<1x2x128xf32, #tpu.memory_space<vmem>>, vector<1x1x128xf32>
    tpu.vector_store %arg5[%c0_16, %c1_17, %c0_18], %19 {strides = array<i32>} : memref<1x2x128xf32, #tpu.memory_space<vmem>>, vector<1x1x128xf32>,
    return
  }
  func.func @transform_0(%arg0: i32, %arg1: i32) -> (i32, i32) {
    %c1_i32 = arith.constant 1 : i32
    %0 = arith.muli %arg0, %c1_i32 : i32
    %1 = arith.addi %0, %arg1 : i32
    %c0_i32 = arith.constant 0 : i32
    %c0_i32_0 = arith.constant 0 : i32
    return %1, %c0_i32 : i32, i32
  }
  func.func @transform_1(%arg0: i32, %arg1: i32) -> (i32, i32) {
    %c0_i32 = arith.constant 0 : i32
    %c0_i32_0 = arith.constant 0 : i32
    return %arg0, %c0_i32 : i32, i32
  }
  func.func @transform_2(%arg0: i32, %arg1: i32) -> (i32, i32) {
    %c1_i32 = arith.constant 1 : i32
    %0 = arith.muli %arg0, %c1_i32 : i32
    %1 = arith.addi %0, %arg1 : i32
    %c0_i32 = arith.constant 0 : i32
    %c0_i32_0 = arith.constant 0 : i32
    return %1, %c0_i32 : i32, i32
  }
  func.func @transform_3(%arg0: i32, %arg1: i32) -> (i32, i32, i32) {
    %c0_i32 = arith.constant 0 : i32
    %c0_i32_0 = arith.constant 0 : i32
    %c0_i32_1 = arith.constant 0 : i32
    return %arg0, %c0_i32, %c0_i32_0 : i32, i32, i32
  }
}

</mosaic_0001>

<bundles_post_ra>
// kernel: run.1
= control target key start
LH: loop header
LB: loop body
LE: loop exit
PB: predicated region body
PF: predicated region fallthrough
CT: control target
= control target key end

     0   :  { %s1120_s12 = smov 0   ;;  %s1122_s13 = smov 0   ;;  %s1296_s0 = inlined_call_operand.vmem [shape: bf16[672,128], index: 0, kind: input, shape index: {}]   ;;  %s1297_s1 = inlined_call_operand.vmem [shape: bf16[512,128], index: 1, kind: input, shape index: {}]   ;;  %s1298_s2 = inlined_call_operand.vmem [shape: bf16[672,128], index: 2, kind: output, shape index: {0}]   ;;  %s1299_s3 = inlined_call_operand.vmem [shape: f32[4,2,128], index: 3, kind: output, shape index: {1}]  }
   0x1   :  { %s1124_s14 = smov 0  }
   0x2 LB: > { %s26_s15 = sadd.s32 1, %s1092_s13  ;;  %p806_p0 = scmp.ge.s32.totalorder %s1096_s14, 1  ;;  %s1096_s14 = sphi %s1124_s14, %s14_s14   ;;  %s1092_s13 = sphi %s1122_s13, %s1301_s13   ;;  %s1088_s12 = sphi %s1120_s12, %s1300_s12  }
   0x3   : > { %p28_p1 = scmp.ge.s32.totalorder %s26_s15, 4  ;;  %p170_p2 = scmp.lt.s32.totalorder %s1096_s14, 5 }
   0x5   : > { %s1303_s15 = smov (%p28_p1, %s26_s15), 0  ;;  %p171_p3 = pnand %p806_p0, %p170_p2 }
   0x6   : > { %s808_s16 = sshll.u32 (!%p171_p3), %s1088_s12, 4  ;;  %s206_s17 = smul.u32 (!%p171_p3), 21, %s1088_s12  ;;  %v1098_v0 = vmov (!%p171_p3), 0.0   ;;  %vm1099_vm0 = vmmov (!%p171_p3), 0  }
   0x7   : > { %174 = sbr.rel (%p171_p3) target bundleno = 340 (0x154), region = 28  ;;  %953 = vmatprep.subr.bf16.mxu0 (!%p171_p3), %v1098_v0  ;;  %p214_p4 = scmp.lt.s32.totalorder (!%p171_p3), %s808_s16, 63  ;;  %1013 = vmatprep.subr.bf16.mxu1 (!%p171_p3), %v1098_v0 }
   0x8   : > { %969 = vmatprep.mubr.msk.bf16.mxu0 (!%p171_p3), %vm1099_vm0, %v1098_v0  ;;  %p207_p5 = scmp.lt.s32.totalorder (!%p171_p3), %s206_s17, 83  ;;  %993 = vmatprep.mubr.msk.bf16.mxu1 (!%p171_p3), %vm1099_vm0, %v1098_v0  ;;  %p227_p6 = scmp.lt.s32.totalorder (!%p171_p3), %s1088_s12, 3 }
   0xe   : > { %s1305_s16 = smov (!%p214_p4, %s808_s16), 63  ;;  %s1307_s17 = smov (!%p207_p5, %s206_s17), 83 }
   0xf   : > { %s809_s18 = sshll.u32 %s1305_s16, 2  ;;  %s807_s22 = sshll.u32 %s1307_s17, 2 }
  0x10   : > { %s1151_s21 = scalar_lea.vmem %s1297_s1, %s809_s18  ;;  %s1167_s25 = scalar_lea.vmem %s1296_s0, %s807_s22 }
  0x11   : > { %v1055_v1 = vld [vmem:[%s1151_s21] sm:$0xff]   ;;  %v1056_v2 = vld [vmem:[%s1151_s21 + $0x8] sm:$0xff]   ;;  %v1057_v3 = vld [vmem:[%s1151_s21 + $0x10] sm:$0xff]   ;;  %s1309_s12 = smov (!%p227_p6, %s1088_s12), 3  ;;  %s1230_s5 = scalar_lea.vmem %s1298_s2, %s807_s22 }
  0x12   : > { %954 = vmatpush3.bf16.msra.mxu0 %v1055_v1  ;;  %1021 = vmatpush3.bf16.msra.mxu1 %v1055_v1  ;;  %v1058_v4 = vld [vmem:[%s1151_s21 + $0x18] sm:$0xff]   ;;  %v1059_v5 = vld [vmem:[%s1151_s21 + $0x20] sm:$0xff]   ;;  %v1060_v6 = vld [vmem:[%s1151_s21 + $0x28] sm:$0xff]   ;;  %s811_s26 = sshll.u32 %s1309_s12, 1 }
  0x13   : > { %955 = vmatprep.subr.bf16.mxu0 %v1098_v0  ;;  %1014 = vmatprep.subr.bf16.mxu1 %v1098_v0  ;;  %v1061_v7 = vld [vmem:[%s1151_s21 + $0x30] sm:$0xff]   ;;  %v1062_v8 = vld [vmem:[%s1151_s21 + $0x38] sm:$0xff]   ;;  %v1063_v9 = vld [vmem:[%s1167_s25] sm:$0xff]   ;;  %s1219_s29 = scalar_lea.vmem %s1299_s3, %s811_s26 }
  0x14   : > { %v1067_v10 = vld [vmem:[%s1167_s25 + $0x30] sm:$0xff]   ;;  %v1064_v11 = vld [vmem:[%s1167_s25 + $0x8] sm:$0xff]   ;;  %v1069_v12 = vld [vmem:[%s1167_s25 + $0x38] sm:$0xff]   ;;  %236 = vst [vmem:[%s1219_s29] sm:$0x3] %v1098_v0 }
  0x15   : > { %v1065_v13 = vld [vmem:[%s1167_s25 + $0x10] sm:$0xff]   ;;  %v1071_v14 = vld [vmem:[%s1167_s25 + $0x40] sm:$0xff]   ;;  %v1066_v15 = vld [vmem:[%s1167_s25 + $0x18] sm:$0xff]  }
  0x16   : > { %956 = vmatpush3.bf16.msra.mxu0 %v1056_v2  ;;  %1022 = vmatpush3.bf16.msra.mxu1 %v1056_v2  ;;  %v1072_v16 = vld [vmem:[%s1167_s25 + $0x48] sm:$0xff]   ;;  %v1068_v17 = vld [vmem:[%s1167_s25 + $0x20] sm:$0xff]   ;;  %v1073_v18 = vld [vmem:[%s1167_s25 + $0x50] ss:$0 sps:$4 sm:$0xff]  }
  0x17   : > { %957 = vmatprep.subr.bf16.mxu0 %v1098_v0  ;;  %1015 = vmatprep.subr.bf16.mxu1 %v1098_v0  ;;  %v1070_v19 = vld [vmem:[%s1167_s25 + $0x28] sm:$0xff]  }
  0x1a   : > { %958 = vmatpush3.bf16.msra.mxu0 %v1057_v3  ;;  %1023 = vmatpush3.bf16.msra.mxu1 %v1057_v3 }
  0x1b   : > { %959 = vmatprep.subr.bf16.mxu0 %v1098_v0  ;;  %1016 = vmatprep.subr.bf16.mxu1 %v1098_v0 }
  0x1e   : > { %960 = vmatpush3.bf16.msra.mxu0 %v1058_v4  ;;  %1024 = vmatpush3.bf16.msra.mxu1 %v1058_v4 }
  0x1f   : > { %961 = vmatprep.subr.bf16.mxu0 %v1098_v0  ;;  %1017 = vmatprep.subr.bf16.mxu1 %v1098_v0 }
  0x22   : > { %962 = vmatpush3.bf16.msra.mxu0 %v1059_v5  ;;  %1025 = vmatpush3.bf16.msra.mxu1 %v1059_v5 }
  0x23   : > { %963 = vmatprep.subr.bf16.mxu0 %v1098_v0  ;;  %1018 = vmatprep.subr.bf16.mxu1 %v1098_v0 }
  0x26   : > { %964 = vmatpush3.bf16.msra.mxu0 %v1060_v6  ;;  %1026 = vmatpush3.bf16.msra.mxu1 %v1060_v6 }
  0x27   : > { %965 = vmatprep.subr.bf16.mxu0 %v1098_v0  ;;  %1019 = vmatprep.subr.bf16.mxu1 %v1098_v0 }
  0x2a   : > { %966 = vmatpush3.bf16.msra.mxu0 %v1061_v7  ;;  %1027 = vmatpush3.bf16.msra.mxu1 %v1061_v7 }
  0x2b   : > { %967 = vmatprep.subr.bf16.mxu0 %v1098_v0  ;;  %1020 = vmatprep.subr.bf16.mxu1 %v1098_v0 }
  0x2e   : > { %968 = vmatpush3.bf16.msra.mxu0 %v1062_v8  ;;  %1028 = vmatpush3.bf16.msra.mxu1 %v1062_v8 }
  0x31   : > { %970 = vmatmul.mubr.bf16.vlgmr.msra.gmra.mrb[0].mxu0 %v1063_v9  ;;  %994 = vmatmul.mubr.bf16.vlgmr.msra.gmra.mrb[0].mxu1 %v1067_v10 }
  0x32   : > { %973 = vmatprep.mubr.msk.bf16.mxu0 %vm1099_vm0, %v1098_v0  ;;  %997 = vmatprep.mubr.msk.bf16.mxu1 %vm1099_vm0, %v1098_v0 }
  0x39   : > { %974 = vmatmul.mubr.bf16.gmra.mrb[4].mxu0 %v1064_v11  ;;  %998 = vmatmul.mubr.bf16.gmra.mrb[4].mxu1 %v1069_v12 }
  0x3a   : > { %977 = vmatprep.mubr.msk.bf16.mxu0 %vm1099_vm0, %v1098_v0  ;;  %1001 = vmatprep.mubr.msk.bf16.mxu1 %vm1099_vm0, %v1098_v0 }
  0x41   : > { %978 = vmatmul.mubr.bf16.gmra.mrb[8].mxu0 %v1065_v13  ;;  %1002 = vmatmul.mubr.bf16.gmra.mrb[8].mxu1 %v1071_v14 }
  0x42   : > { %981 = vmatprep.mubr.msk.bf16.mxu0 %vm1099_vm0, %v1098_v0  ;;  %1005 = vmatprep.mubr.msk.bf16.mxu1 %vm1099_vm0, %v1098_v0 }
  0x49   : > { %982 = vmatmul.mubr.bf16.gmra.mrb[12].mxu0 %v1066_v15  ;;  %1006 = vmatmul.mubr.bf16.gmra.mrb[12].mxu1 %v1072_v16 }
  0x4a   : > { %985 = vmatprep.mubr.msk.bf16.mxu0 %vm1099_vm0, %v1098_v0  ;;  %1009 = vmatprep.mubr.msk.bf16.mxu1 %vm1099_vm0, %v1098_v0 }
  0x51   : > { %986 = vmatmul.mubr.bf16.gmra.mrb[16].mxu0 %v1068_v17  ;;  %1010 = vmatmul.mubr.bf16.gmra.mrb[16].mxu1 %v1073_v18 }
  0x52   : > { %989 = vmatprep.mubr.msk.bf16.mxu0 %vm1099_vm0, %v1098_v0 }
  0x59   : > { %990 = vmatmul.mubr.bf16.gmra.mrb[20].mxu0 %v1070_v19 }
 0x104   : > { %v420_v20 = vpop.f32.mrb[0].mxu0  ;;  %v1223_v21 = vpop.f32.mrb[0].mxu1 }
 0x105   : > { %v971_v22 = vpop.f32.mrb[1].mxu0  ;;  %v995_v23 = vpop.f32.mrb[1].mxu1  ;;  %v638_v24 = vmul.f32 %v420_v20, %v420_v20 }
 0x106   : > { %v423_v25 = vpop.f32.mrb[2].mxu0  ;;  %v1232_v26 = vpop.f32.mrb[2].mxu1 }
 0x107   : > { %v878_v27 = vpack.c.bf16 %v423_v25, %v420_v20  ;;  %v612_v28 = vadd.f32 %v423_v25, %v420_v20  ;;  %v639_v29 = vmul.f32 %v423_v25, %v423_v25  ;;  %v972_v30 = vpop.f32.mrb[3].mxu0  ;;  %v908_v31 = vpack.c.bf16 %v1232_v26, %v1223_v21  ;;  %v996_v32 = vpop.f32.mrb[3].mxu1 }
 0x109   : > { %879 = vst [vmem:[%s1230_s5] sm:$0xff] %v878_v27   ;;  %v659_v33 = vadd.f32 %v639_v29, %v638_v24  ;;  %930 = vst [vmem:[%s1230_s5 + $0x30] sm:$0xff] %v908_v31  }
 0x10c   : > { %v428_v34 = vpop.f32.mrb[4].mxu0  ;;  %v1238_v35 = vpop.f32.mrb[4].mxu1 }
 0x10d   : > { %v613_v36 = vadd.f32 %v612_v28, %v428_v34  ;;  %v640_v37 = vmul.f32 %v428_v34, %v428_v34  ;;  %v975_v38 = vpop.f32.mrb[5].mxu0  ;;  %v999_v39 = vpop.f32.mrb[5].mxu1 }
 0x10e   : > { %v431_v40 = vpop.f32.mrb[6].mxu0  ;;  %v1240_v41 = vpop.f32.mrb[6].mxu1 }
 0x10f   : > { %v660_v42 = vadd.f32 %v659_v33, %v640_v37  ;;  %v883_v43 = vpack.c.bf16 %v431_v40, %v428_v34  ;;  %v614_v44 = vadd.f32 %v613_v36, %v431_v40  ;;  %v641_v45 = vmul.f32 %v431_v40, %v431_v40  ;;  %v976_v46 = vpop.f32.mrb[7].mxu0  ;;  %v1000_v47 = vpop.f32.mrb[7].mxu1 }
 0x110   : > { %v913_v48 = vpack.c.bf16 %v1240_v41, %v1238_v35 }
 0x111   : > { %925 = vst [vmem:[%s1230_s5 + $0x8] sm:$0xff] %v883_v43   ;;  %v661_v49 = vadd.f32 %v660_v42, %v641_v45 }
 0x112   : > { %931 = vst [vmem:[%s1230_s5 + $0x38] sm:$0xff] %v913_v48   ;;  %v650_v48 = vmul.f32 %v1223_v21, %v1223_v21 }
 0x114   : > { %v436_v50 = vpop.f32.mrb[8].mxu0  ;;  %v1246_v51 = vpop.f32.mrb[8].mxu1 }
 0x115   : > { %v615_v52 = vadd.f32 %v614_v44, %v436_v50  ;;  %v642_v53 = vmul.f32 %v436_v50, %v436_v50  ;;  %v979_v54 = vpop.f32.mrb[9].mxu0  ;;  %v1003_v55 = vpop.f32.mrb[9].mxu1 }
 0x116   : > { %v439_v56 = vpop.f32.mrb[10].mxu0  ;;  %v1248_v57 = vpop.f32.mrb[10].mxu1  ;;  %v652_v55 = vmul.f32 %v1238_v35, %v1238_v35 }
 0x117   : > { %v662_v58 = vadd.f32 %v661_v49, %v642_v53  ;;  %v888_v59 = vpack.c.bf16 %v439_v56, %v436_v50  ;;  %v616_v60 = vadd.f32 %v615_v52, %v439_v56  ;;  %v643_v61 = vmul.f32 %v439_v56, %v439_v56  ;;  %v980_v62 = vpop.f32.mrb[11].mxu0  ;;  %v1004_v63 = vpop.f32.mrb[11].mxu1 }
 0x118   : > { %v918_v0 = vpack.c.bf16 %v1248_v57, %v1246_v51  ;;  %v651_v52 = vmul.f32 %v1232_v26, %v1232_v26 }
 0x119   : > { %926 = vst [vmem:[%s1230_s5 + $0x10] sm:$0xff] %v888_v59   ;;  %v663_v1 = vadd.f32 %v662_v58, %v643_v61  ;;  %v653_v59 = vmul.f32 %v1240_v41, %v1240_v41 }
 0x11a   : > { %932 = vst [vmem:[%s1230_s5 + $0x40] sm:$0xff] %v918_v0   ;;  %v655_v0 = vmul.f32 %v1248_v57, %v1248_v57 }
 0x11c   : > { %v444_v2 = vpop.f32.mrb[12].mxu0  ;;  %v1254_v3 = vpop.f32.mrb[12].mxu1 }
 0x11d   : > { %v617_v4 = vadd.f32 %v616_v60, %v444_v2  ;;  %v644_v5 = vmul.f32 %v444_v2, %v444_v2  ;;  %v983_v6 = vpop.f32.mrb[13].mxu0  ;;  %v1007_v7 = vpop.f32.mrb[13].mxu1 }
 0x11e   : > { %v447_v8 = vpop.f32.mrb[14].mxu0  ;;  %v495_v9 = vpop.f32.mrb[14].mxu1 }
 0x11f   : > { %v664_v10 = vadd.f32 %v663_v1, %v644_v5  ;;  %v893_v11 = vpack.c.bf16 %v447_v8, %v444_v2  ;;  %v618_v12 = vadd.f32 %v617_v4, %v447_v8  ;;  %v645_v13 = vmul.f32 %v447_v8, %v447_v8  ;;  %v984_v14 = vpop.f32.mrb[15].mxu0  ;;  %v1008_v15 = vpop.f32.mrb[15].mxu1 }
 0x120   : > { %v923_v16 = vpack.c.bf16 %v495_v9, %v1254_v3  ;;  %v656_v4 = vmul.f32 %v1254_v3, %v1254_v3  ;;  %v657_v6 = vmul.f32 %v495_v9, %v495_v9 }
 0x121   : > { %927 = vst [vmem:[%s1230_s5 + $0x18] sm:$0xff] %v893_v11   ;;  %v665_v17 = vadd.f32 %v664_v10, %v645_v13 }
 0x122   : > { %933 = vst [vmem:[%s1230_s5 + $0x48] sm:$0xff] %v923_v16  }
 0x124   : > { %v452_v18 = vpop.f32.mrb[16].mxu0  ;;  %v500_v19 = vpop.f32.mrb[16].mxu1 }
 0x125   : > { %v619_v20 = vadd.f32 %v618_v12, %v452_v18  ;;  %v646_v22 = vmul.f32 %v452_v18, %v452_v18  ;;  %v987_v23 = vpop.f32.mrb[17].mxu0  ;;  %v874_v24 = vpack.c.bf16 %v500_v19, %v500_v19  ;;  %v1011_v25 = vpop.f32.mrb[17].mxu1  ;;  %v658_v7 = vmul.f32 %v500_v19, %v500_v19 }
 0x126   : > { %v455_v27 = vpop.f32.mrb[18].mxu0  ;;  %v503_v28 = vpop.f32.mrb[18].mxu1 }
 0x127   : > { %v666_v29 = vadd.f32 %v665_v17, %v646_v22  ;;  %v898_v30 = vpack.c.bf16 %v455_v27, %v452_v18  ;;  %v620_v31 = vadd.f32 %v619_v20, %v455_v27  ;;  %v647_v32 = vmul.f32 %v455_v27, %v455_v27  ;;  %v988_v33 = vpop.f32.mrb[19].mxu0  ;;  %611 = vst [vmem:[%s1230_s5 + $0x50] sm:$0xf] %v874_v24  ;;  %v1012_v34 = vpop.f32.mrb[19].mxu1  ;;  %v685_v18 = vld [vmem:[%s1219_s29] sm:$0x1] }
 0x129   : > { %928 = vst [vmem:[%s1230_s5 + $0x20] sm:$0xff] %v898_v30   ;;  %v667_v36 = vadd.f32 %v666_v29, %v647_v32 }
 0x12c   : > { %v460_v37 = vpop.f32.mrb[20].mxu0 }
 0x12d   : > { %v621_v38 = vadd.f32 %v620_v31, %v460_v37  ;;  %v648_v39 = vmul.f32 %v460_v37, %v460_v37  ;;  %v991_v40 = vpop.f32.mrb[21].mxu0 }
 0x12e   : > { %v463_v42 = vpop.f32.mrb[22].mxu0 }
 0x12f   : > { %v668_v43 = vadd.f32 %v667_v36, %v648_v39  ;;  %v903_v44 = vpack.c.bf16 %v463_v42, %v460_v37  ;;  %v622_v45 = vadd.f32 %v621_v38, %v463_v42  ;;  %v649_v46 = vmul.f32 %v463_v42, %v463_v42  ;;  %v992_v47 = vpop.f32.mrb[23].mxu0 }
 0x131   : > { %929 = vst [vmem:[%s1230_s5 + $0x28] sm:$0xff] %v903_v44   ;;  %v623_v49 = vadd.f32 %v622_v45, %v1223_v21  ;;  %v669_v50 = vadd.f32 %v668_v43, %v649_v46  ;;  %v654_v21 = vmul.f32 %v1246_v51, %v1246_v51 }
 0x133   : > { %v624_v53 = vadd.f32 %v623_v49, %v1232_v26  ;;  %v670_v54 = vadd.f32 %v669_v50, %v650_v48 }
 0x135   : > { %v671_v56 = vadd.f32 %v670_v54, %v651_v52  ;;  %v625_v58 = vadd.f32 %v624_v53, %v1238_v35 }
 0x137   : > { %v626_v60 = vadd.f32 %v625_v58, %v1240_v41  ;;  %v672_v61 = vadd.f32 %v671_v56, %v652_v55 }
 0x139   : > { %v627_v62 = vadd.f32 %v626_v60, %v1246_v51  ;;  %v673_v63 = vadd.f32 %v672_v61, %v653_v59 }
 0x13b   : > { %v628_v26 = vadd.f32 %v627_v62, %v1248_v57  ;;  %v674_v1 = vadd.f32 %v673_v63, %v654_v21 }
 0x13d   : > { %v675_v2 = vadd.f32 %v674_v1, %v655_v0  ;;  %v629_v35 = vadd.f32 %v628_v26, %v1254_v3 }
 0x13f   : > { %v676_v41 = vadd.f32 %v675_v2, %v656_v4  ;;  %v630_v5 = vadd.f32 %v629_v35, %v495_v9  ;;  %v688_v9 = vld [vmem:[%s1219_s29 + $0x1] sm:$0x1] }
 0x141   : > { %v677_v51 = vadd.f32 %v676_v41, %v657_v6  ;;  %v631_v8 = vadd.f32 %v630_v5, %v500_v19 }
 0x143   : > { %v632_v10 = vrot.slane %v631_v8, 4  ;;  %v678_v11 = vadd.f32 %v677_v51, %v658_v7 }
 0x145   : > { %v633_v12 = vadd.f32 %v632_v10, %v631_v8  ;;  %v679_v57 = vrot.slane %v678_v11, 4 }
 0x147   : > { %v634_v13 = vrot.slane %v633_v12, 2  ;;  %v680_v14 = vadd.f32 %v679_v57, %v678_v11 }
 0x149   : > { %v635_v15 = vadd.f32 %v634_v13, %v633_v12  ;;  %v681_v16 = vrot.slane %v680_v14, 2 }
 0x14b   : > { %v636_v17 = vrot.slane %v635_v15, 1  ;;  %v682_v3 = vadd.f32 %v681_v16, %v680_v14 }
 0x14d   : > { %v637_v20 = vadd.f32 %v636_v17, %v635_v15  ;;  %v683_v22 = vrot.slane %v682_v3, 1 }
 0x14f   : > { %v684_v23 = vadd.f32 %v683_v22, %v682_v3  ;;  %v686_v24 = vadd.f32 %v685_v18, %v637_v20 }
 0x151   : > { %687 = vst [vmem:[%s1219_s29] sm:$0x1] %v686_v24  ;;  %v689_v19 = vadd.f32 %v688_v9, %v684_v23 }
 0x153   : > { %690 = vst [vmem:[%s1219_s29 + $0x1] sm:$0x1] %v689_v19 }
 0x154 PF: > { %s14_s14 = sadd.s32 1, %s1096_s14   ;;  %s1300_s12 = smov %s1092_s13 }
 0x155   : > { %p11_p7 = scmp.ge.s32.totalorder %s14_s14, 6   ;;  %s1301_s13 = smov %s1303_s15 }
 0x157   :  { %13 = sbr.rel (!%p11_p7) target bundleno = 2 (0x2), region = 77 }

</bundles_post_ra>
